<compile_context>
chip_gen: v6e
topology: v6e:2x2x1
jax: 0.10.0
libtpu: 0.0.40
codegen_flags: <defaults>
</compile_context>

<pallas_src>
import jax
import jax.numpy as jnp
from jax.experimental import pallas as pl
from jax.experimental.pallas import tpu as pltpu


KH = KW = 3  # 3x3 kernel, stride 1, 'same' padding


def _conv_band_kernel(xpad_ref, wband_ref, brow_ref, o_ref):
    """3x3 / stride-1 / 'same' conv for the whole (tiny) batch as one matmul.

    xpad_ref  : (N, H+2, (W+2)*Cin)  zero-padded, lane-dense input slabs (f32)
    wband_ref : (KH*(W+2)*Cin, W*Cout) = (216, 128)  band weight matrix (f32)
    brow_ref  : (1, W*Cout) = (1, 128)  lane-tiled bias row (f32)
    o_ref     : (N*H, W*Cout) = (32, 128)  lane-dense output
    """
    n_batch, hp, _ = xpad_ref.shape
    h_out = hp - (KH - 1)  # = H

    # Build A = (N*H, KH*(W+2)*Cin): for each batch element, three row-shifted
    # full-lane slabs of the padded input concatenated along lanes.  No scratch
    # refs, no masked stores, no strided-lane gathers.
    rows = []
    for n in range(n_batch):                      # static Python loop, N = 2
        xp = xpad_ref[n]                          # (H+2, (W+2)*Cin)
        rows.append(jnp.concatenate(
            [xp[kh:kh + h_out, :] for kh in range(KH)], axis=1))
    a = jnp.concatenate(rows, axis=0)             # (N*H, KH*(W+2)*Cin) = (32, 216)

    # Single MXU matmul: M=32, K=216, N=128 (vs. K=36 / N=8 previously).
    acc = jnp.dot(a, wband_ref[...], preferred_element_type=jnp.float32)  # (32, 128)

    # Lane-dense epilogue: one broadcast bias add, one unmasked full-lane store.
    o_ref[...] = (acc + brow_ref[...]).astype(o_ref.dtype)


def _conv2d_band_pallas(xpad, wband, brow):
    """Single-invocation Pallas call: whole batch, one matmul, lane-dense I/O."""
    n, hp, wpc = xpad.shape
    h = hp - 2
    k, wcout = wband.shape

    flops = 2 * n * h * k * wcout
    bytes_accessed = 4 * (xpad.size + wband.size + brow.size + n * h * wcout)

    return pl.pallas_call(
        _conv_band_kernel,
        out_shape=jax.ShapeDtypeStruct((n * h, wcout), xpad.dtype),
        grid=(1,),  # batch folded into one step: no per-batch pipeline overhead
        in_specs=[
            pl.BlockSpec((n, hp, wpc), lambda i: (0, 0, 0)),
            pl.BlockSpec((k, wcout), lambda i: (0, 0)),
            pl.BlockSpec((1, wcout), lambda i: (0, 0)),
        ],
        out_specs=pl.BlockSpec((n * h, wcout), lambda i: (0, 0)),
        compiler_params=pltpu.CompilerParams(
            vmem_limit_bytes=2 * 1024 * 1024,   # footprint is ~0.3 MiB
        ),
        cost_estimate=pl.CostEstimate(
            flops=flops, transcendentals=0, bytes_accessed=bytes_accessed),
    )(xpad, wband, brow)


def _build_band_weights(w_oihw, W):
    """Band matrix B[(kh, w', ci), (w, co)] = W_hwio[kh, w'-w, ci, co] if w'-w in [0,3).

    Built once in the wrapper, outside the checkpointed region (weights-only).
    """
    Cout, Cin, kh_, kw_ = w_oihw.shape
    w_hwio = jnp.transpose(w_oihw, (2, 3, 1, 0)).astype(jnp.float32)  # (KH,KW,Cin,Cout)
    wprime = jnp.arange(W + 2)
    w_out = jnp.arange(W)
    kw_idx = jnp.arange(kw_)
    onehot = (wprime[:, None, None] ==
              (w_out[None, :, None] + kw_idx[None, None, :])).astype(jnp.float32)
    # band[kh, w', ci, w, co] = sum_kw onehot[w', w, kw] * w_hwio[kh, kw, ci, co]
    band = jnp.einsum('pwk,hkio->hpiwo', onehot, w_hwio)
    return band.reshape(kh_ * (W + 2) * Cin, W * Cout)


def recomputation_checkpoint_forward(x_nchw, w_oihw, bias):
    """RecomputationCheckpoint(Conv2d).forward -- NCHW in, NCHW out."""
    N, Cin, H, W = x_nchw.shape
    Cout = w_oihw.shape[0]
    assert w_oihw.shape[2:] == (KH, KW)

    # Weight/bias prep hoisted OUT of the checkpointed region (not re-executed
    # during backward rematerialization).
    wband = _build_band_weights(w_oihw, W)                       # (216, 128)
    brow = jnp.tile(bias.astype(jnp.float32), (W,)).reshape(1, W * Cout)  # (1, 128)

    def layer(x, wband_arg, brow_arg):
        # One fused XLA layout pass each way (transpose+pad+reshape is ~10 KiB).
        x_nhwc = jnp.transpose(x, (0, 2, 3, 1))                   # NCHW -> NHWC
        xpad = jnp.pad(x_nhwc, ((0, 0), (1, 1), (1, 1), (0, 0)))  # halo
        xpad = xpad.reshape(N, H + 2, (W + 2) * Cin)              # lane-dense slab
        out_flat = _conv2d_band_pallas(xpad, wband_arg, brow_arg)  # (N*H, W*Cout)
        y_nhwc = out_flat.reshape(N, H, W, Cout)
        return jnp.transpose(y_nhwc, (0, 3, 1, 2))                # NHWC -> NCHW

    # poptorch.recomputationCheckpoint == identity in forward; jax.checkpoint marks
    # the rematerialization boundary for backward, matching the original module.
    return jax.checkpoint(layer)(x_nchw, wband, brow)


if __name__ == "__main__":
    key = jax.random.PRNGKey(0)
    k_x, k_w, k_b = jax.random.split(key, 3)

    N, Cin, H, W = 2, 4, 16, 16
    Cout = 8

    x = jax.random.normal(k_x, (N, Cin, H, W), dtype=jnp.float32)
    fan_in = Cin * KH * KW
    w = jax.random.normal(k_w, (Cout, Cin, KH, KW), dtype=jnp.float32) / jnp.sqrt(fan_in)
    b = jax.random.normal(k_b, (Cout,), dtype=jnp.float32) * 0.01

    y = jax.jit(recomputation_checkpoint_forward)(x, w, b)
    y = jax.block_until_ready(y)

    # Reference check against XLA's conv (NCHW, OIHW, SAME padding) + bias
    y_ref = jax.lax.conv_general_dilated(
        x, w, window_strides=(1, 1), padding="SAME",
        dimension_numbers=("NCHW", "OIHW", "NCHW"),
    ) + b.reshape(1, Cout, 1, 1)

    assert y.shape == (N, Cout, H, W), y.shape
    assert jnp.allclose(y, y_ref, rtol=1e-4, atol=1e-4), "mismatch vs reference conv"

    print("KERNEL_OK")
</pallas_src>

<mosaic_0001>
module attributes {stable_mosaic.version = 11 : i64} {
  func.func @_conv_band_kernel(%arg0: i32, %arg1: memref<2x18x72xf32, #tpu.memory_space<vmem>>, %arg2: memref<216x128xf32, #tpu.memory_space<vmem>>, %arg3: memref<1x128xf32, #tpu.memory_space<vmem>>, %arg4: memref<32x128xf32, #tpu.memory_space<vmem>>) attributes {dimension_semantics = [#tpu.dimension_semantics<arbitrary>], iteration_bounds = array<i64: 1>, scalar_prefetch = 0 : i64, scratch_operands = 0 : i64, tpu.core_type = #tpu.core_type<tc>, window_params = [{pipeline_mode = #tpu.pipeline_mode<synchronous>, transform_indices = @transform_0, window_bounds = array<i64: 2, 18, 72>}, {pipeline_mode = #tpu.pipeline_mode<synchronous>, transform_indices = @transform_1, window_bounds = array<i64: 216, 128>}, {pipeline_mode = #tpu.pipeline_mode<synchronous>, transform_indices = @transform_2, window_bounds = array<i64: 1, 128>}, {pipeline_mode = #tpu.pipeline_mode<synchronous>, transform_indices = @transform_3, window_bounds = array<i64: 32, 128>}]} {
    %c0 = arith.constant 0 : index
    %c0_0 = arith.constant 0 : index
    %c0_1 = arith.constant 0 : index
    %0 = vector.load %arg1[%c0, %c0_0, %c0_1] : memref<2x18x72xf32, #tpu.memory_space<vmem>>, vector<1x18x72xf32>
    %1 = vector.shape_cast %0 : vector<1x18x72xf32> to vector<18x72xf32>
    %2 = vector.extract_strided_slice %1 {offsets = [0, 0], sizes = [16, 72], strides = [1, 1]} : vector<18x72xf32> to vector<16x72xf32>
    %3 = vector.extract_strided_slice %1 {offsets = [1, 0], sizes = [16, 72], strides = [1, 1]} : vector<18x72xf32> to vector<16x72xf32>
    %4 = vector.extract_strided_slice %1 {offsets = [2, 0], sizes = [16, 72], strides = [1, 1]} : vector<18x72xf32> to vector<16x72xf32>
    %5 = tpu.concatenate %2, %3, %4 in 1 : vector<16x72xf32>, vector<16x72xf32>, vector<16x72xf32> -> vector<16x216xf32>
    %c1 = arith.constant 1 : index
    %c0_2 = arith.constant 0 : index
    %c0_3 = arith.constant 0 : index
    %6 = vector.load %arg1[%c1, %c0_2, %c0_3] : memref<2x18x72xf32, #tpu.memory_space<vmem>>, vector<1x18x72xf32>
    %7 = vector.shape_cast %6 : vector<1x18x72xf32> to vector<18x72xf32>
    %8 = vector.extract_strided_slice %7 {offsets = [0, 0], sizes = [16, 72], strides = [1, 1]} : vector<18x72xf32> to vector<16x72xf32>
    %9 = vector.extract_strided_slice %7 {offsets = [1, 0], sizes = [16, 72], strides = [1, 1]} : vector<18x72xf32> to vector<16x72xf32>
    %10 = vector.extract_strided_slice %7 {offsets = [2, 0], sizes = [16, 72], strides = [1, 1]} : vector<18x72xf32> to vector<16x72xf32>
    %11 = tpu.concatenate %8, %9, %10 in 1 : vector<16x72xf32>, vector<16x72xf32>, vector<16x72xf32> -> vector<16x216xf32>
    %12 = tpu.concatenate %5, %11 in 0 : vector<16x216xf32>, vector<16x216xf32> -> vector<32x216xf32>
    %c0_4 = arith.constant 0 : index
    %c0_5 = arith.constant 0 : index
    %13 = vector.load %arg2[%c0_4, %c0_5] : memref<216x128xf32, #tpu.memory_space<vmem>>, vector<216x128xf32>
    %cst = arith.constant dense<0.000000e+00> : vector<32x128xf32>
    %14 = tpu.matmul %12, %13, %cst {dimension_numbers = #tpu.dot_dimension_numbers<[1], [0], [0], [1], [0, 0, 1, 1], [], []>} : vector<32x216xf32>, vector<216x128xf32>, vector<32x128xf32> -> vector<32x128xf32>
    %c0_6 = arith.constant 0 : index
    %c0_7 = arith.constant 0 : index
    %15 = vector.load %arg3[%c0_6, %c0_7] : memref<1x128xf32, #tpu.memory_space<vmem>>, vector<1x128xf32>
    %16 = vector.broadcast %15 : vector<1x128xf32> to vector<32x128xf32>
    %17 = arith.addf %14, %16 : vector<32x128xf32>
    %c0_8 = arith.constant 0 : index
    %c0_9 = arith.constant 0 : index
    %18 = vector.load %arg4[%c0_8, %c0_9] : memref<32x128xf32, #tpu.memory_space<vmem>>, vector<32x128xf32>
    tpu.vector_store %arg4[%c0_8, %c0_9], %17 {strides = array<i32>} : memref<32x128xf32, #tpu.memory_space<vmem>>, vector<32x128xf32>,
    return
  }
  func.func @transform_0(%arg0: i32) -> (i32, i32, i32) {
    %c0_i32 = arith.constant 0 : i32
    %c0_i32_0 = arith.constant 0 : i32
    %c0_i32_1 = arith.constant 0 : i32
    %c0_i32_2 = arith.constant 0 : i32
    return %c0_i32, %c0_i32_0, %c0_i32_1 : i32, i32, i32
  }
  func.func @transform_1(%arg0: i32) -> (i32, i32) {
    %c0_i32 = arith.constant 0 : i32
    %c0_i32_0 = arith.constant 0 : i32
    %c0_i32_1 = arith.constant 0 : i32
    return %c0_i32, %c0_i32_0 : i32, i32
  }
  func.func @transform_2(%arg0: i32) -> (i32, i32) {
    %c0_i32 = arith.constant 0 : i32
    %c0_i32_0 = arith.constant 0 : i32
    %c0_i32_1 = arith.constant 0 : i32
    return %c0_i32, %c0_i32_0 : i32, i32
  }
  func.func @transform_3(%arg0: i32) -> (i32, i32) {
    %c0_i32 = arith.constant 0 : i32
    %c0_i32_0 = arith.constant 0 : i32
    %c0_i32_1 = arith.constant 0 : i32
    return %c0_i32, %c0_i32_0 : i32, i32
  }
}

</mosaic_0001>

<bundles_post_ra>
// kernel: tile.8
= control target key start
LH: loop header
LB: loop body
LE: loop exit
PB: predicated region body
PF: predicated region fallthrough
CT: control target
= control target key end

     0   :  { %s28_s0 = inlined_call_operand.vmem [shape: f32[8], index: 0, kind: input, shape index: {}]   ;;  %s29_s1 = inlined_call_operand.vmem [shape: f32[16,8], index: 1, kind: output, shape index: {}]  }
   0x1   :  { %v4_v0 = vld [vmem:[%s28_s0] ss:$0 sm:$0xff] }
   0x2   :  { %5 = vst [vmem:[%s29_s1] sm:$0xff] %v4_v0  ;;  %8 = vst [vmem:[%s29_s1 + $0x8] sm:$0xff] %v4_v0 }

// kernel: tile.9
= control target key start
LH: loop header
LB: loop body
LE: loop exit
PB: predicated region body
PF: predicated region fallthrough
CT: control target
= control target key end

     0   :  { %s133_s10 = smov 120   ;;  %s134_s11 = smov 104   ;;  %vm3_vm0 = vcmask 64512   ;;  %vm9_vm1 = vcmask 1048512   ;;  %vm15_vm2 = vcmask 982912   ;;  %vm21_vm3 = vcmask 917312   ;;  %s209_s0 = inlined_call_operand.vmem [shape: f32[16,8], index: 0, kind: input, shape index: {}]   ;;  %s210_s1 = inlined_call_operand.vmem [shape: f32[1,128], index: 1, kind: output, shape index: {}]  }
   0x1   :  { %v103_v0 = vld [vmem:[%s209_s0 + $0xf] sm:$0x1]   ;;  %v105_v1 = vld [vmem:[%s209_s0 + $0xd] sm:$0x1]   ;;  %v104_v2 = vld [vmem:[%s209_s0 + $0xe] sm:$0x1]  }
   0x2   :  { %7 = vrot.lane.b32.xlu0 %v103_v0, %s133_s10  ;;  %19 = vrot.lane.b32.xlu1 %v105_v1, %s134_s11  ;;  %v106_v3 = vld [vmem:[%s209_s0 + $0xc] sm:$0x1]   ;;  %s135_s16 = smov 112   ;;  %s136_s17 = smov 96   ;;  %v107_v4 = vld [vmem:[%s209_s0 + $0xb] sm:$0x1]  }
   0x3   :  { %v108_v5 = vld [vmem:[%s209_s0 + $0xa] sm:$0x1]   ;;  %v2_v6 = vld [vmem:[%s209_s0] sm:$0x1]   ;;  %s137_s24 = smov 88   ;;  %s138_s25 = smov 80  }
   0x4   :  { %4 = vst.msk [vmem:[#allocation0] sm:$0x1] %vm3_vm0, %v2_v6   ;;  %v109_v7 = vld [vmem:[%s209_s0 + $0x9] sm:$0x1]   ;;  %v110_v8 = vld [vmem:[%s209_s0 + $0x8] sm:$0x1]  }
   0x5   :  { %s139_s30 = smov 72   ;;  %s140_s2 = smov 64   ;;  %v111_v9 = vld [vmem:[%s209_s0 + $0x7] sm:$0x1]   ;;  %v112_v10 = vld [vmem:[%s209_s0 + $0x6] sm:$0x1]  }
   0x6   :  { %13 = vrot.lane.b32.xlu0 %v104_v2, %s135_s16  ;;  %25 = vrot.lane.b32.xlu1 %v106_v3, %s136_s17  ;;  %s141_s7 = smov 56   ;;  %s142_s8 = smov 48   ;;  %v113_v11 = vld [vmem:[%s209_s0 + $0x5] sm:$0x1]   ;;  %v114_v12 = vld [vmem:[%s209_s0 + $0x4] sm:$0x1]  }
   0x7   :  { %s143_s13 = smov 40   ;;  %s144_s14 = smov 32   ;;  %v115_v13 = vld [vmem:[%s209_s0 + $0x3] sm:$0x1]   ;;  %v116_v14 = vld [vmem:[%s209_s0 + $0x2] sm:$0x1]  }
   0x8   :  { %s145_s19 = smov 24   ;;  %s146_s20 = smov 16   ;;  %v117_v15 = vld [vmem:[%s209_s0 + $0x1] sm:$0x1]   ;;  %vm27_vm4 = vcmask 851712   ;;  %vm33_vm5 = vcmask 786112  }
   0x9   :  { %s147_s0 = smov 8   ;;  %vm39_vm6 = vcmask 720512   ;;  %vm45_vm7 = vcmask 654912   ;;  %vm51_vm8 = vcmask 589312   ;;  %vm57_vm9 = vcmask 523712  }
   0xa   :  { %31 = vrot.lane.b32.xlu0 %v107_v4, %s137_s24  ;;  %37 = vrot.lane.b32.xlu1 %v108_v5, %s138_s25  ;;  %vm63_vm10 = vcmask 458112   ;;  %vm69_vm11 = vcmask 392512   ;;  %vm75_vm12 = vcmask 326912   ;;  %vm81_vm13 = vcmask 261312  }
   0xb   :  { %vm87_vm14 = vcmask 195712   ;;  %vm93_vm15 = vcmask 130112  }
   0xe   :  { %43 = vrot.lane.b32.xlu0 %v109_v7, %s139_s30  ;;  %49 = vrot.lane.b32.xlu1 %v110_v8, %s140_s2 }
  0x12   :  { %55 = vrot.lane.b32.xlu0 %v111_v9, %s141_s7  ;;  %61 = vrot.lane.b32.xlu1 %v112_v10, %s142_s8 }
  0x16   :  { %67 = vrot.lane.b32.xlu0 %v113_v11, %s143_s13  ;;  %73 = vrot.lane.b32.xlu1 %v114_v12, %s144_s14 }
  0x1a   :  { %79 = vrot.lane.b32.xlu0 %v115_v13, %s145_s19  ;;  %85 = vrot.lane.b32.xlu1 %v116_v14, %s146_s20 }
  0x1e   :  { %91 = vrot.lane.b32.xlu0 %v117_v15, %s147_s0 }
  0x74   :  { %v8_v16 = vpop.permute.xlu0 %7   ;;  %v20_v17 = vpop.permute.xlu1 %19  }
  0x75   :  { %10 = vst.msk [vmem:[#allocation0] sm:$0x1] %vm9_vm1, %v8_v16  }
  0x78   :  { %v14_v18 = vpop.permute.xlu0 %13   ;;  %v26_v19 = vpop.permute.xlu1 %25  }
  0x79   :  { %16 = vst.msk [vmem:[#allocation0] sm:$0x1] %vm15_vm2, %v14_v18  }
  0x7a   :  { %22 = vst.msk [vmem:[#allocation0] sm:$0x1] %vm21_vm3, %v20_v17  }
  0x7b   :  { %28 = vst.msk [vmem:[#allocation0] sm:$0x1] %vm27_vm4, %v26_v19  }
  0x7c   :  { %v32_v20 = vpop.permute.xlu0 %31   ;;  %v38_v21 = vpop.permute.xlu1 %37  }
  0x7d   :  { %34 = vst.msk [vmem:[#allocation0] sm:$0x1] %vm33_vm5, %v32_v20  }
  0x7e   :  { %40 = vst.msk [vmem:[#allocation0] sm:$0x1] %vm39_vm6, %v38_v21  }
  0x80   :  { %v44_v22 = vpop.permute.xlu0 %43   ;;  %v50_v23 = vpop.permute.xlu1 %49  }
  0x81   :  { %46 = vst.msk [vmem:[#allocation0] sm:$0x1] %vm45_vm7, %v44_v22  }
  0x82   :  { %52 = vst.msk [vmem:[#allocation0] sm:$0x1] %vm51_vm8, %v50_v23  }
  0x84   :  { %v56_v24 = vpop.permute.xlu0 %55   ;;  %v62_v25 = vpop.permute.xlu1 %61  }
  0x85   :  { %58 = vst.msk [vmem:[#allocation0] sm:$0x1] %vm57_vm9, %v56_v24  }
  0x86   :  { %64 = vst.msk [vmem:[#allocation0] sm:$0x1] %vm63_vm10, %v62_v25  }
  0x88   :  { %v68_v26 = vpop.permute.xlu0 %67   ;;  %v74_v27 = vpop.permute.xlu1 %73  }
  0x89   :  { %70 = vst.msk [vmem:[#allocation0] sm:$0x1] %vm69_vm11, %v68_v26  }
  0x8a   :  { %76 = vst.msk [vmem:[#allocation0] sm:$0x1] %vm75_vm12, %v74_v27  }
  0x8c   :  { %v80_v28 = vpop.permute.xlu0 %79   ;;  %v86_v29 = vpop.permute.xlu1 %85  }
  0x8d   :  { %82 = vst.msk [vmem:[#allocation0] sm:$0x1] %vm81_vm13, %v80_v28  }
  0x8e   :  { %88 = vst.msk [vmem:[#allocation0] sm:$0x1] %vm87_vm14, %v86_v29  }
  0x90   :  { %v92_v30 = vpop.permute.xlu0 %91  }
  0x91   :  { %94 = vst.msk [vmem:[#allocation0] sm:$0x1] %vm93_vm15, %v92_v30  }
  0x98   :  { %v99_v31 = vld [vmem:[#allocation0] sm:$0x1] }
  0x99   :  { %102 = vst [vmem:[%s210_s1] sm:$0x1] %v99_v31 }

// kernel: checkpoint.1
= control target key start
LH: loop header
LB: loop body
LE: loop exit
PB: predicated region body
PF: predicated region fallthrough
CT: control target
= control target key end

     0   :  { %vm20_vm0 = vcmask 1046528   ;;  %vm32_vm1 = vcmask 1045504   ;;  %v288_v3 = vmov 0.0   ;;  %s289_s26 = smov 72   ;;  %s290_s6 = smov 16   ;;  %vm47_vm2 = vcmask 130048   ;;  %s523_s0 = inlined_call_operand.vmem [shape: f32[2,18,72], index: 0, kind: input, shape index: {}]   ;;  %s524_s1 = inlined_call_operand.vmem [shape: f32[216,128], index: 1, kind: input, shape index: {}]   ;;  %s525_s2 = inlined_call_operand.vmem [shape: f32[1,128], index: 2, kind: input, shape index: {}]   ;;  %s526_s3 = inlined_call_operand.vmem [shape: f32[32,128], index: 3, kind: output, shape index: {}]  }
   0x1   :  { %v314_v0 = vld [vmem:[%s523_s0 + $0x18] sm:$0xff]  ;;  %v319_v1 = vld [vmem:[%s523_s0 + $0x20] sm:$0xff]  ;;  %130 = vmatprep.subr.mxu0 %v288_v3  ;;  %231 = vmatprep.subr.mxu1 %v288_v3  ;;  %v333_v6 = vld [vmem:[%s523_s0 + $0x8] sm:$0xff]  ;;  %vm117_vm3 = vcmask 719872   ;;  %vm44_vm4 = vcmask 588800  }
   0x2   :  { %v324_v2 = vld [vmem:[%s523_s0] sm:$0xff]  ;;  %v57_v4 = vrot.slane %v314_v0, 1  ;;  %v58_v5 = vrot.slane %v319_v1, 1  ;;  %v68_v8 = vrot.slane %v314_v0, 2  ;;  %v98_v9 = vld [vmem:[%s524_s1 + $0x78] sm:$0xff]  ;;  %v22_v10 = vrot.slane %v333_v6, 1 }
   0x3   :  { %v21_v7 = vrot.slane %v324_v2, 1  ;;  %v69_v11 = vrot.slane %v319_v1, 2  ;;  %v33_v12 = vrot.slane %v324_v2, 2  ;;  %v34_v13 = vrot.slane %v333_v6, 2  ;;  %v16_v14 = vld [vmem:[%s523_s0 + $0x10] sm:$0x3]  ;;  %131 = vmatpush1.msra.mxu0 %v98_v9  ;;  %258 = vmatpush1.msra.mxu1 %v98_v9 }
   0x4   :  { %v59_v15 = vsel %vm20_vm0, %v57_v4, %v58_v5  ;;  %132 = vmatprep.subr.mxu0 %v288_v3  ;;  %232 = vmatprep.subr.mxu1 %v288_v3  ;;  %v97_v16 = vld [vmem:[%s524_s1 + $0x70] sm:$0xff]  ;;  %v96_v18 = vld [vmem:[%s524_s1 + $0x68] sm:$0xff]  ;;  %v36_v20 = vrot.slane %v16_v14, 2  ;;  %v24_v22 = vrot.slane %v16_v14, 1  ;;  %v95_v24 = vld [vmem:[%s524_s1 + $0x60] sm:$0xff] }
   0x5   :  { %62 = vrot.lane.b32.xlu1 %v59_v15, %s289_s26  ;;  %v23_v17 = vsel %vm20_vm0, %v21_v7, %v22_v10  ;;  %133 = vmatpush1.msra.mxu0 %v97_v16  ;;  %v70_v19 = vsel %vm32_vm1, %v68_v8, %v69_v11  ;;  %v35_v21 = vsel %vm32_vm1, %v33_v12, %v34_v13  ;;  %v225_v23 = vld [vmem:[%s523_s0 + $0x28] sm:$0x3]  ;;  %v94_v27 = vld [vmem:[%s524_s1 + $0x58] sm:$0xff]  ;;  %v93_v30 = vld [vmem:[%s524_s1 + $0x50] sm:$0xff] }
   0x6   :  { %26 = vrot.lane.b32.xlu0 %v23_v17, %s289_s26  ;;  %259 = vmatpush1.msra.mxu1 %v97_v16  ;;  %v37_v25 = vsel %vm32_vm1, %v34_v13, %v36_v20  ;;  %v71_v26 = vrot.slane %v225_v23, 2  ;;  %v25_v28 = vsel %vm20_vm0, %v22_v10, %v24_v22  ;;  %v60_v29 = vrot.slane %v225_v23, 1  ;;  %v92_v33 = vld [vmem:[%s524_s1 + $0x48] sm:$0xff]  ;;  %v91_v34 = vld [vmem:[%s524_s1 + $0x40] sm:$0xff]  ;;  %v90_v35 = vld [vmem:[%s524_s1 + $0x38] sm:$0xff] }
   0x7   :  { %134 = vmatprep.subr.mxu0 %v288_v3  ;;  %233 = vmatprep.subr.mxu1 %v288_v3  ;;  %v89_v36 = vld [vmem:[%s524_s1 + $0x30] sm:$0xff]  ;;  %v88_v37 = vld [vmem:[%s524_s1 + $0x28] sm:$0xff]  ;;  %v87_v38 = vld [vmem:[%s524_s1 + $0x20] sm:$0xff] }
   0x8   :  { %135 = vmatpush1.msra.mxu0 %v96_v18  ;;  %260 = vmatpush1.msra.mxu1 %v96_v18  ;;  %v72_v31 = vsel %vm32_vm1, %v69_v11, %v71_v26  ;;  %v61_v32 = vsel %vm20_vm0, %v58_v5, %v60_v29  ;;  %v86_v39 = vld [vmem:[%s524_s1 + $0x18] sm:$0xff]  ;;  %v85_v40 = vld [vmem:[%s524_s1 + $0x10] sm:$0xff]  ;;  %v84_v41 = vld [vmem:[%s524_s1 + $0x8] sm:$0xff] }
   0x9   :  { %73 = vrot.lane.b32.xlu1 %v70_v19, %s290_s6  ;;  %136 = vmatprep.subr.mxu0 %v288_v3  ;;  %v83_v42 = vld [vmem:[%s524_s1] sm:$0xff]  ;;  %v109_v43 = vld [vmem:[%s524_s1 + $0xd0] sm:$0xff]  ;;  %v108_v44 = vld [vmem:[%s524_s1 + $0xc8] sm:$0xff] }
   0xa   :  { %38 = vrot.lane.b32.xlu0 %v35_v21, %s290_s6  ;;  %234 = vmatprep.subr.mxu1 %v288_v3  ;;  %v107_v45 = vld [vmem:[%s524_s1 + $0xc0] sm:$0xff]  ;;  %v106_v46 = vld [vmem:[%s524_s1 + $0xb8] sm:$0xff]  ;;  %v105_v47 = vld [vmem:[%s524_s1 + $0xb0] sm:$0xff] }
   0xb   :  { %137 = vmatpush1.msra.mxu0 %v95_v24  ;;  %261 = vmatpush1.msra.mxu1 %v95_v24  ;;  %v104_v48 = vld [vmem:[%s524_s1 + $0xa8] sm:$0xff]  ;;  %v103_v49 = vld [vmem:[%s524_s1 + $0xa0] sm:$0xff]  ;;  %v102_v50 = vld [vmem:[%s524_s1 + $0x98] sm:$0xff] }
   0xc   :  { %138 = vmatprep.subr.mxu0 %v288_v3  ;;  %235 = vmatprep.subr.mxu1 %v288_v3  ;;  %v101_v51 = vld [vmem:[%s524_s1 + $0x90] sm:$0xff]  ;;  %v100_v52 = vld [vmem:[%s524_s1 + $0x88] sm:$0xff]  ;;  %v99_v53 = vld [vmem:[%s524_s1 + $0x80] sm:$0xff] }
   0xd   :  { %40 = vrot.lane.b32.xlu1 %v37_v25, %s290_s6  ;;  %139 = vmatpush1.msra.mxu0 %v94_v27 }
   0xe   :  { %28 = vrot.lane.b32.xlu0 %v25_v28, %s289_s26  ;;  %262 = vmatpush1.msra.mxu1 %v94_v27 }
   0xf   :  { %140 = vmatprep.subr.mxu0 %v288_v3  ;;  %236 = vmatprep.subr.mxu1 %v288_v3 }
  0x10   :  { %141 = vmatpush1.msra.mxu0 %v93_v30  ;;  %263 = vmatpush1.msra.mxu1 %v93_v30 }
  0x11   :  { %75 = vrot.lane.b32.xlu1 %v72_v31, %s290_s6  ;;  %142 = vmatprep.subr.mxu0 %v288_v3 }
  0x12   :  { %64 = vrot.lane.b32.xlu0 %v61_v32, %s289_s26  ;;  %237 = vmatprep.subr.mxu1 %v288_v3 }
  0x13   :  { %143 = vmatpush1.msra.mxu0 %v92_v33  ;;  %264 = vmatpush1.msra.mxu1 %v92_v33 }
  0x14   :  { %144 = vmatprep.subr.mxu0 %v288_v3  ;;  %238 = vmatprep.subr.mxu1 %v288_v3 }
  0x15   :  { %145 = vmatpush1.msra.mxu0 %v91_v34  ;;  %265 = vmatpush1.msra.mxu1 %v91_v34 }
  0x16   :  { %146 = vmatprep.subr.mxu0 %v288_v3  ;;  %239 = vmatprep.subr.mxu1 %v288_v3 }
  0x17   :  { %147 = vmatpush1.msra.mxu0 %v90_v35  ;;  %266 = vmatpush1.msra.mxu1 %v90_v35 }
  0x18   :  { %148 = vmatprep.subr.mxu0 %v288_v3  ;;  %240 = vmatprep.subr.mxu1 %v288_v3 }
  0x19   :  { %149 = vmatpush1.msra.mxu0 %v89_v36  ;;  %267 = vmatpush1.msra.mxu1 %v89_v36 }
  0x1a   :  { %150 = vmatprep.subr.mxu0 %v288_v3  ;;  %241 = vmatprep.subr.mxu1 %v288_v3 }
  0x1b   :  { %151 = vmatpush1.msra.mxu0 %v88_v37  ;;  %268 = vmatpush1.msra.mxu1 %v88_v37 }
  0x1c   :  { %152 = vmatprep.subr.mxu0 %v288_v3  ;;  %242 = vmatprep.subr.mxu1 %v288_v3 }
  0x1d   :  { %153 = vmatpush1.msra.mxu0 %v87_v38  ;;  %269 = vmatpush1.msra.mxu1 %v87_v38 }
  0x1e   :  { %154 = vmatprep.subr.mxu0 %v288_v3  ;;  %243 = vmatprep.subr.mxu1 %v288_v3 }
  0x1f   :  { %155 = vmatpush1.msra.mxu0 %v86_v39  ;;  %270 = vmatpush1.msra.mxu1 %v86_v39 }
  0x20   :  { %156 = vmatprep.subr.mxu0 %v288_v3  ;;  %244 = vmatprep.subr.mxu1 %v288_v3 }
  0x21   :  { %157 = vmatpush1.msra.mxu0 %v85_v40  ;;  %271 = vmatpush1.msra.mxu1 %v85_v40 }
  0x22   :  { %158 = vmatprep.subr.mxu0 %v288_v3  ;;  %245 = vmatprep.subr.mxu1 %v288_v3 }
  0x23   :  { %159 = vmatpush1.msra.mxu0 %v84_v41  ;;  %272 = vmatpush1.msra.mxu1 %v84_v41 }
  0x24   :  { %160 = vmatprep.subr.mxu0 %v288_v3  ;;  %246 = vmatprep.subr.mxu1 %v288_v3 }
  0x25   :  { %161 = vmatpush1.msra.mxu0 %v83_v42  ;;  %273 = vmatpush1.msra.mxu1 %v83_v42 }
  0x26   :  { %172 = vmatprep.subr.mxu0 %v288_v3  ;;  %247 = vmatprep.subr.mxu1 %v288_v3 }
  0x27   :  { %173 = vmatpush2.msra.mxu0 %v109_v43  ;;  %274 = vmatpush2.msra.mxu1 %v109_v43 }
  0x28   :  { %174 = vmatprep.subr.mxu0 %v288_v3  ;;  %248 = vmatprep.subr.mxu1 %v288_v3 }
  0x29   :  { %175 = vmatpush2.msra.mxu0 %v108_v44  ;;  %275 = vmatpush2.msra.mxu1 %v108_v44 }
  0x2a   :  { %176 = vmatprep.subr.mxu0 %v288_v3  ;;  %249 = vmatprep.subr.mxu1 %v288_v3 }
  0x2b   :  { %177 = vmatpush2.msra.mxu0 %v107_v45  ;;  %276 = vmatpush2.msra.mxu1 %v107_v45 }
  0x2c   :  { %178 = vmatprep.subr.mxu0 %v288_v3  ;;  %250 = vmatprep.subr.mxu1 %v288_v3 }
  0x2d   :  { %179 = vmatpush2.msra.mxu0 %v106_v46  ;;  %277 = vmatpush2.msra.mxu1 %v106_v46 }
  0x2e   :  { %180 = vmatprep.subr.mxu0 %v288_v3  ;;  %251 = vmatprep.subr.mxu1 %v288_v3 }
  0x2f   :  { %181 = vmatpush2.msra.mxu0 %v105_v47  ;;  %278 = vmatpush2.msra.mxu1 %v105_v47 }
  0x30   :  { %182 = vmatprep.subr.mxu0 %v288_v3  ;;  %252 = vmatprep.subr.mxu1 %v288_v3 }
  0x31   :  { %183 = vmatpush2.msra.mxu0 %v104_v48  ;;  %279 = vmatpush2.msra.mxu1 %v104_v48 }
  0x32   :  { %184 = vmatprep.subr.mxu0 %v288_v3  ;;  %253 = vmatprep.subr.mxu1 %v288_v3 }
  0x33   :  { %185 = vmatpush2.msra.mxu0 %v103_v49  ;;  %280 = vmatpush2.msra.mxu1 %v103_v49 }
  0x34   :  { %186 = vmatprep.subr.mxu0 %v288_v3  ;;  %254 = vmatprep.subr.mxu1 %v288_v3 }
  0x35   :  { %187 = vmatpush2.msra.mxu0 %v102_v50  ;;  %281 = vmatpush2.msra.mxu1 %v102_v50 }
  0x36   :  { %188 = vmatprep.subr.mxu0 %v288_v3  ;;  %255 = vmatprep.subr.mxu1 %v288_v3 }
  0x37   :  { %189 = vmatpush2.msra.mxu0 %v101_v51  ;;  %282 = vmatpush2.msra.mxu1 %v101_v51 }
  0x38   :  { %190 = vmatprep.subr.mxu0 %v288_v3  ;;  %256 = vmatprep.subr.mxu1 %v288_v3 }
  0x39   :  { %191 = vmatpush2.msra.mxu0 %v100_v52  ;;  %283 = vmatpush2.msra.mxu1 %v100_v52 }
  0x3a   :  { %192 = vmatprep.subr.mxu0 %v288_v3  ;;  %257 = vmatprep.subr.mxu1 %v288_v3 }
  0x3b   :  { %193 = vmatpush2.msra.mxu0 %v99_v53  ;;  %284 = vmatpush2.msra.mxu1 %v99_v53 }
  0x77   :  { %v63_v54 = vpop.permute.xlu1 %62 }
  0x78   :  { %v27_v55 = vpop.permute.xlu0 %26  ;;  %v79_v60 = vsel %vm44_vm4, %v314_v0, %v63_v54 }
  0x79   :  { %v45_v61 = vsel %vm44_vm4, %v324_v2, %v27_v55  ;;  %v226_v2 = vld [vmem:[%s525_s2] ss:$0 sm:$0xff] }
  0x7b   :  { %v74_v56 = vpop.permute.xlu1 %73 }
  0x7c   :  { %v39_v57 = vpop.permute.xlu0 %38  ;;  %v81_v58 = vsel %vm47_vm2, %v63_v54, %v74_v56 }
  0x7d   :  { %v48_v59 = vsel %vm47_vm2, %v27_v55, %v39_v57  ;;  %229 = vmatprep.mubr.msk.f32.mxu1 %vm117_vm3, %v81_v58 }
  0x7e   :  { %227 = vmatprep.mubr.msk.f32.mxu0 %vm117_vm3, %v48_v59  ;;  %205 = vmatmul.mubr.f32.vlgmr.msra.gmra.mxu1 %v79_v60 }
  0x7f   :  { %195 = vmatmul.mubr.f32.vlgmr.msra.gmra.mxu0 %v45_v61  ;;  %v41_v62 = vpop.permute.xlu1 %40 }
  0x80   :  { %v29_v63 = vpop.permute.xlu0 %28 }
  0x81   :  { %v49_v3 = vsel %vm47_vm2, %v29_v63, %v41_v62  ;;  %v46_v4 = vsel %vm44_vm4, %v333_v6, %v29_v63 }
  0x82   :  { %228 = vmatprep.mubr.msk.f32.mxu0 %vm117_vm3, %v49_v3 }
  0x83   :  { %200 = vmatmul.mubr.f32.gmra.mxu0 %v46_v4  ;;  %v76_v5 = vpop.permute.xlu1 %75 }
  0x84   :  { %v65_v7 = vpop.permute.xlu0 %64 }
  0x85   :  { %v82_v0 = vsel %vm47_vm2, %v65_v7, %v76_v5  ;;  %v80_v8 = vsel %vm44_vm4, %v319_v1, %v65_v7 }
  0x86   :  { %230 = vmatprep.mubr.msk.f32.mxu1 %vm117_vm3, %v82_v0 }
  0x87   :  { %210 = vmatmul.mubr.f32.gmra.mxu1 %v80_v8 }
 0x13e   :  { %v206_v9 = vpop.f32.mrf.mxu1 }
 0x13f   :  { %v196_v10 = vpop.f32.mrf.mxu0  ;;  %v207_v6 = vadd.f32 %v226_v2, %v206_v9 }
 0x140   :  { %v197_v11 = vadd.f32 %v226_v2, %v196_v10  ;;  %v208_v12 = vpop.f32.mrf.mxu1 }
 0x141   :  { %217 = vst [vmem:[%s526_s3 + $0x10] sm:$0xff] %v207_v6  ;;  %v198_v13 = vpop.f32.mrf.mxu0 }
 0x142   :  { %215 = vst [vmem:[%s526_s3] sm:$0xff] %v197_v11 }
 0x143   :  { %v201_v1 = vpop.f32.mrf.mxu0 }
 0x144   :  { %v202_v14 = vadd.f32 %v226_v2, %v201_v1 }
 0x145   :  { %v203_v15 = vpop.f32.mrf.mxu0 }
 0x146   :  { %216 = vst [vmem:[%s526_s3 + $0x8] sm:$0xff] %v202_v14 }
 0x147   :  { %v211_v16 = vpop.f32.mrf.mxu1 }
 0x148   :  { %v212_v17 = vadd.f32 %v226_v2, %v211_v16 }
 0x149   :  { %v213_v18 = vpop.f32.mrf.mxu1 }
 0x14a   :  { %218 = vst [vmem:[%s526_s3 + $0x18] sm:$0xff] %v212_v17 }

</bundles_post_ra>
